<compile_context>
chip_gen: v6e
topology: v6e:2x2x1
jax: 0.10.0
libtpu: 0.0.40
codegen_flags: <defaults>
</compile_context>

<pallas_src>
import math
import jax
import jax.numpy as jnp
from jax.experimental import pallas as pl
from jax.experimental.pallas import tpu as pltpu


def _sigmoid(x):
    # sigmoid(x) == 0.5 * (tanh(x/2) + 1): single EUP op, no VPU divide.
    return 0.5 * (jnp.tanh(0.5 * x) + 1.0)


# ---------------------------------------------------------------------------
# Kernel 1: whole-sequence x-projection (non-recurrent, hoisted).
# ---------------------------------------------------------------------------
def gru_xproj_kernel(x_ref, wx_ref, bx_ref, gx_ref):
    """gx[g] = X @ Wx[g] + b[g]  for g in (r, z, hbar).

    x_ref:  (T*B, n_embd)    bf16
    wx_ref: (3, n_embd, n2)  bf16
    bx_ref: (3, 1, n2)       f32
    gx_ref: (3, T*B, n2)     f32   (gate-major: each gate slab is lane-dense)
    """
    x = x_ref[...]
    for g in range(3):  # static, unrolled: three lane-aligned MXU passes
        gx_ref[g] = (
            jnp.dot(x, wx_ref[g], preferred_element_type=jnp.float32) + bx_ref[g]
        )


# ---------------------------------------------------------------------------
# Kernel 2: the recurrence.  grid=(T,) "arbitrary"; weights stay VMEM-resident.
# ---------------------------------------------------------------------------
def gru_seq_kernel(gx_ref, whrz_ref, whn_ref, h0_ref, hseq_ref, h_sc):
    """One GRU step per grid iteration; h carried in f32 VMEM scratch.

    gx_ref:   (3, 1, B, n2)  f32   precomputed x-projection (+bias) for step t
    whrz_ref: (2, n2, n2)    bf16  h-parts of [r, z]      (same block every t)
    whn_ref:  (n2, n2)       bf16  h-part of hbar         (same block every t)
    h0_ref:   (B, n2)        f32   initial hidden state   (same block every t)
    hseq_ref: (1, B, n2)     f32   output slab for step t
    h_sc:     (B, n2)        f32   carried state (persists across grid steps)
    """
    t = pl.program_id(0)

    @pl.when(t == 0)
    def _():
        h_sc[...] = h0_ref[...]

    h = h_sc[...]                        # f32 carry: bf16 error does not compound
    h16 = h.astype(jnp.bfloat16)         # bf16 MXU operand

    # Per-gate dots indexed on a leading gate axis: no 32-lane-offset slicing
    # of a fused result vreg; every gate slab is its own lane-dense block.
    ghr = jnp.dot(h16, whrz_ref[0], preferred_element_type=jnp.float32)
    ghz = jnp.dot(h16, whrz_ref[1], preferred_element_type=jnp.float32)
    r = _sigmoid(gx_ref[0, 0] + ghr)
    z = _sigmoid(gx_ref[1, 0] + ghz)

    hr16 = (r * h).astype(jnp.bfloat16)  # reset-gated state (depends on r)
    ghn = jnp.dot(hr16, whn_ref[...], preferred_element_type=jnp.float32)
    hbar = jnp.tanh(gx_ref[2, 0] + ghn)

    h_new = h + z * (hbar - h)           # == (1 - z) * h + z * hbar
    h_sc[...] = h_new
    hseq_ref[0] = h_new.astype(hseq_ref.dtype)


# ---------------------------------------------------------------------------
# One-time weight prep (hoisted completely out of the per-step path).
# ---------------------------------------------------------------------------
def prepare_gru_params(w_r, b_r, w_z, b_z, w_hbar, b_hbar, n_embd):
    """Each w_* has nn.Linear layout (n2, n_embd + n2); each b_* is (n2,)."""
    wx = jnp.stack(
        [w_r[:, :n_embd].T, w_z[:, :n_embd].T, w_hbar[:, :n_embd].T]
    ).astype(jnp.bfloat16)                                   # (3, n_embd, n2)
    bx = jnp.stack([b_r, b_z, b_hbar])[:, None, :].astype(jnp.float32)  # (3,1,n2)
    wh_rz = jnp.stack(
        [w_r[:, n_embd:].T, w_z[:, n_embd:].T]
    ).astype(jnp.bfloat16)                                   # (2, n2, n2)
    wh_n = w_hbar[:, n_embd:].T.astype(jnp.bfloat16)         # (n2, n2)
    return wx, bx, wh_rz, wh_n


# ---------------------------------------------------------------------------
# Wrappers
# ---------------------------------------------------------------------------
def gru_sequence(x_seq, h0, params):
    """Run T GRU steps; returns all hidden states (T, B, n2)."""
    wx, bx, wh_rz, wh_n = params
    T, B, n_embd = x_seq.shape
    n2 = h0.shape[1]
    assert wx.shape == (3, n_embd, n2)
    assert bx.shape == (3, 1, n2)
    assert wh_rz.shape == (2, n2, n2)
    assert wh_n.shape == (n2, n2)

    full = lambda shape: pl.BlockSpec(shape, lambda: (0,) * len(shape))

    # ---- Pass 1 (non-recurrent): x-projection for the whole sequence -------
    x2d = x_seq.reshape(T * B, n_embd).astype(jnp.bfloat16)  # bf16 at boundary
    gx = pl.pallas_call(
        gru_xproj_kernel,
        out_shape=jax.ShapeDtypeStruct((3, T * B, n2), jnp.float32),
        grid=(),
        in_specs=[full(x2d.shape), full(wx.shape), full(bx.shape)],
        out_specs=full((3, T * B, n2)),
    )(x2d, wx, bx)
    # Layout plumbing only (hoisted, outside the recurrence): gate-major 4D view.
    gx = gx.reshape(3, T, B, n2)

    # ---- Pass 2 (recurrent): T on the grid, weights VMEM-resident ----------
    h_seq = pl.pallas_call(
        gru_seq_kernel,
        out_shape=jax.ShapeDtypeStruct((T, B, n2), jnp.float32),
        grid=(T,),
        in_specs=[
            pl.BlockSpec((3, 1, B, n2), lambda t: (0, t, 0, 0)),  # gx slab for t
            pl.BlockSpec((2, n2, n2), lambda t: (0, 0, 0)),       # resident
            pl.BlockSpec((n2, n2), lambda t: (0, 0)),             # resident
            pl.BlockSpec((B, n2), lambda t: (0, 0)),              # resident
        ],
        out_specs=pl.BlockSpec((1, B, n2), lambda t: (t, 0, 0)),
        scratch_shapes=[pltpu.VMEM((B, n2), jnp.float32)],
        compiler_params=pltpu.CompilerParams(
            dimension_semantics=("arbitrary",)),
    )(gx, wh_rz, wh_n, h0)
    return h_seq


def gru_cell(xt, hprev, params):
    """Single GRU step == the PyTorch module's forward(xt, hprev)."""
    return gru_sequence(xt[None], hprev, params)[0]


# ---------------------------------------------------------------------------
# Pure-JAX f32 references matching the PyTorch GRUCell.forward
# ---------------------------------------------------------------------------
def gru_cell_ref(xt, hprev, w_r, b_r, w_z, b_z, w_hbar, b_hbar):
    xh = jnp.concatenate([xt, hprev], axis=1)
    r = jax.nn.sigmoid(xh @ w_r.T + b_r)
    xhr = jnp.concatenate([xt, r * hprev], axis=1)
    hbar = jnp.tanh(xhr @ w_hbar.T + b_hbar)
    z = jax.nn.sigmoid(xh @ w_z.T + b_z)
    return (1.0 - z) * hprev + z * hbar


def gru_sequence_ref(x_seq, h0, *weights):
    h = h0
    outs = []
    for t in range(x_seq.shape[0]):
        h = gru_cell_ref(x_seq[t], h, *weights)
        outs.append(h)
    return jnp.stack(outs)


if __name__ == "__main__":
    # small config consistent with the module: n_embd=16, n_embd2=32, B=2, T=8
    B, n_embd, n_embd2, T = 2, 16, 32, 8
    fan_in = n_embd + n_embd2

    key = jax.random.PRNGKey(0)
    k_x, k_h, k_wr, k_br, k_wz, k_bz, k_wn, k_bn = jax.random.split(key, 8)

    x_seq = jax.random.normal(k_x, (T, B, n_embd), dtype=jnp.float32)
    hprev = jax.random.normal(k_h, (B, n_embd2), dtype=jnp.float32)

    # deterministic nn.Linear-style init: U(-1/sqrt(fan_in), 1/sqrt(fan_in))
    bound = 1.0 / math.sqrt(fan_in)
    uni = lambda k, shape: jax.random.uniform(
        k, shape, minval=-bound, maxval=bound, dtype=jnp.float32)
    w_r, b_r = uni(k_wr, (n_embd2, fan_in)), uni(k_br, (n_embd2,))
    w_z, b_z = uni(k_wz, (n_embd2, fan_in)), uni(k_bz, (n_embd2,))
    w_hbar, b_hbar = uni(k_wn, (n_embd2, fan_in)), uni(k_bn, (n_embd2,))
    ref_weights = (w_r, b_r, w_z, b_z, w_hbar, b_hbar)

    # One-time weight prep (outside any timestep loop).
    params = prepare_gru_params(w_r, b_r, w_z, b_z, w_hbar, b_hbar, n_embd)

    # --- single step: exact module forward semantics -------------------------
    ht = gru_cell(x_seq[0], hprev, params)
    jax.block_until_ready(ht)
    ht_ref = gru_cell_ref(x_seq[0], hprev, *ref_weights)
    assert ht.shape == (B, n_embd2)
    assert jnp.allclose(ht, ht_ref, atol=3e-2, rtol=3e-2)

    # --- full sequence: in-kernel time loop, weights VMEM-resident -----------
    h_all = gru_sequence(x_seq, hprev, params)
    jax.block_until_ready(h_all)
    h_all_ref = gru_sequence_ref(x_seq, hprev, *ref_weights)
    assert h_all.shape == (T, B, n_embd2)
    # bf16 MXU operands with f32 accumulation / f32 carried h -> small error
    # that stays bounded across the 8 steps.
    assert jnp.allclose(h_all, h_all_ref, atol=5e-2, rtol=5e-2)

    print("KERNEL_OK")
</pallas_src>

<mosaic_0001>
module attributes {stable_mosaic.version = 11 : i64} {
  func.func @gru_xproj_kernel(%arg0: memref<2x16xbf16, #tpu.memory_space<vmem>>, %arg1: memref<3x16x32xbf16, #tpu.memory_space<vmem>>, %arg2: memref<3x1x32xf32, #tpu.memory_space<vmem>>, %arg3: memref<3x2x32xf32, #tpu.memory_space<vmem>>) attributes {dimension_semantics = [], scalar_prefetch = 0 : i64, scratch_operands = 0 : i64, tpu.core_type = #tpu.core_type<tc>} {
    %c0 = arith.constant 0 : index
    %c0_0 = arith.constant 0 : index
    %0 = vector.load %arg0[%c0, %c0_0] : memref<2x16xbf16, #tpu.memory_space<vmem>>, vector<2x16xbf16>
    %c0_1 = arith.constant 0 : index
    %c0_2 = arith.constant 0 : index
    %c0_3 = arith.constant 0 : index
    %1 = vector.load %arg1[%c0_1, %c0_2, %c0_3] : memref<3x16x32xbf16, #tpu.memory_space<vmem>>, vector<1x16x32xbf16>
    %2 = vector.shape_cast %1 : vector<1x16x32xbf16> to vector<16x32xbf16>
    %cst = arith.constant dense<0.000000e+00> : vector<2x32xf32>
    %3 = tpu.matmul %0, %2, %cst {dimension_numbers = #tpu.dot_dimension_numbers<[1], [0], [0], [1], [0, 0, 1, 1], [], []>} : vector<2x16xbf16>, vector<16x32xbf16>, vector<2x32xf32> -> vector<2x32xf32>
    %c0_4 = arith.constant 0 : index
    %c0_5 = arith.constant 0 : index
    %c0_6 = arith.constant 0 : index
    %4 = vector.load %arg2[%c0_4, %c0_5, %c0_6] : memref<3x1x32xf32, #tpu.memory_space<vmem>>, vector<1x1x32xf32>
    %5 = vector.shape_cast %4 : vector<1x1x32xf32> to vector<1x32xf32>
    %6 = vector.broadcast %5 : vector<1x32xf32> to vector<2x32xf32>
    %7 = arith.addf %3, %6 : vector<2x32xf32>
    %c0_7 = arith.constant 0 : index
    %c0_8 = arith.constant 0 : index
    %c0_9 = arith.constant 0 : index
    %8 = vector.load %arg3[%c0_7, %c0_8, %c0_9] : memref<3x2x32xf32, #tpu.memory_space<vmem>>, vector<1x2x32xf32>
    %9 = vector.shape_cast %8 : vector<1x2x32xf32> to vector<2x32xf32>
    %10 = vector.shape_cast %7 : vector<2x32xf32> to vector<1x2x32xf32>
    tpu.vector_store %arg3[%c0_7, %c0_8, %c0_9], %10 {strides = array<i32>} : memref<3x2x32xf32, #tpu.memory_space<vmem>>, vector<1x2x32xf32>,
    %c1 = arith.constant 1 : index
    %c0_10 = arith.constant 0 : index
    %c0_11 = arith.constant 0 : index
    %11 = vector.load %arg1[%c1, %c0_10, %c0_11] : memref<3x16x32xbf16, #tpu.memory_space<vmem>>, vector<1x16x32xbf16>
    %12 = vector.shape_cast %11 : vector<1x16x32xbf16> to vector<16x32xbf16>
    %cst_12 = arith.constant dense<0.000000e+00> : vector<2x32xf32>
    %13 = tpu.matmul %0, %12, %cst_12 {dimension_numbers = #tpu.dot_dimension_numbers<[1], [0], [0], [1], [0, 0, 1, 1], [], []>} : vector<2x16xbf16>, vector<16x32xbf16>, vector<2x32xf32> -> vector<2x32xf32>
    %c1_13 = arith.constant 1 : index
    %c0_14 = arith.constant 0 : index
    %c0_15 = arith.constant 0 : index
    %14 = vector.load %arg2[%c1_13, %c0_14, %c0_15] : memref<3x1x32xf32, #tpu.memory_space<vmem>>, vector<1x1x32xf32>
    %15 = vector.shape_cast %14 : vector<1x1x32xf32> to vector<1x32xf32>
    %16 = vector.broadcast %15 : vector<1x32xf32> to vector<2x32xf32>
    %17 = arith.addf %13, %16 : vector<2x32xf32>
    %c1_16 = arith.constant 1 : index
    %c0_17 = arith.constant 0 : index
    %c0_18 = arith.constant 0 : index
    %18 = vector.load %arg3[%c1_16, %c0_17, %c0_18] : memref<3x2x32xf32, #tpu.memory_space<vmem>>, vector<1x2x32xf32>
    %19 = vector.shape_cast %18 : vector<1x2x32xf32> to vector<2x32xf32>
    %20 = vector.shape_cast %17 : vector<2x32xf32> to vector<1x2x32xf32>
    tpu.vector_store %arg3[%c1_16, %c0_17, %c0_18], %20 {strides = array<i32>} : memref<3x2x32xf32, #tpu.memory_space<vmem>>, vector<1x2x32xf32>,
    %c2 = arith.constant 2 : index
    %c0_19 = arith.constant 0 : index
    %c0_20 = arith.constant 0 : index
    %21 = vector.load %arg1[%c2, %c0_19, %c0_20] : memref<3x16x32xbf16, #tpu.memory_space<vmem>>, vector<1x16x32xbf16>
    %22 = vector.shape_cast %21 : vector<1x16x32xbf16> to vector<16x32xbf16>
    %cst_21 = arith.constant dense<0.000000e+00> : vector<2x32xf32>
    %23 = tpu.matmul %0, %22, %cst_21 {dimension_numbers = #tpu.dot_dimension_numbers<[1], [0], [0], [1], [0, 0, 1, 1], [], []>} : vector<2x16xbf16>, vector<16x32xbf16>, vector<2x32xf32> -> vector<2x32xf32>
    %c2_22 = arith.constant 2 : index
    %c0_23 = arith.constant 0 : index
    %c0_24 = arith.constant 0 : index
    %24 = vector.load %arg2[%c2_22, %c0_23, %c0_24] : memref<3x1x32xf32, #tpu.memory_space<vmem>>, vector<1x1x32xf32>
    %25 = vector.shape_cast %24 : vector<1x1x32xf32> to vector<1x32xf32>
    %26 = vector.broadcast %25 : vector<1x32xf32> to vector<2x32xf32>
    %27 = arith.addf %23, %26 : vector<2x32xf32>
    %c2_25 = arith.constant 2 : index
    %c0_26 = arith.constant 0 : index
    %c0_27 = arith.constant 0 : index
    %28 = vector.load %arg3[%c2_25, %c0_26, %c0_27] : memref<3x2x32xf32, #tpu.memory_space<vmem>>, vector<1x2x32xf32>
    %29 = vector.shape_cast %28 : vector<1x2x32xf32> to vector<2x32xf32>
    %30 = vector.shape_cast %27 : vector<2x32xf32> to vector<1x2x32xf32>
    tpu.vector_store %arg3[%c2_25, %c0_26, %c0_27], %30 {strides = array<i32>} : memref<3x2x32xf32, #tpu.memory_space<vmem>>, vector<1x2x32xf32>,
    return
  }
}

</mosaic_0001>

<bundles_post_ra>
// kernel: tpu_custom_call.1
= control target key start
LH: loop header
LB: loop body
LE: loop exit
PB: predicated region body
PF: predicated region fallthrough
CT: control target
= control target key end

     0   :  { %8 = vsyncpa [#allocation3], 0  ;;  %s403_s0 = inlined_call_operand.hbm [shape: bf16[2,16], index: 0, kind: input, shape index: {}]   ;;  %s404_s1 = inlined_call_operand.hbm [shape: bf16[3,16,32], index: 1, kind: input, shape index: {}]   ;;  %s405_s2 = inlined_call_operand.vmem [shape: f32[3,1,32], index: 2, kind: input, shape index: {}]   ;;  %s406_s3 = inlined_call_operand.hbm [shape: f32[3,2,32], index: 3, kind: output, shape index: {}]  }
   0x1   :  { %9 = vsyncpa [#allocation6], 0 }
   0x2   :  { %10 = vsyncpa [#allocation4], 0  ;;  %s353_s12 = smov [#allocation2]   ;;  %s354_s14 = smov [#allocation5]  }
   0x3   :  { %s17_s13 = sshll.u32 %s353_s12, 4  ;;  %s26_s15 = sshll.u32 %s354_s14, 4  ;;  %s18_s13 = int_to_ptr.vmem [resolvable:$true] %s17_s13  ;;  %s27_s15 = int_to_ptr.vmem [resolvable:$true] %s26_s15 }
   0x4   :  { %s295_s16 = scalar_lea.vmem %s18_s13, 16  ;;  %s299_s17 = scalar_lea.vmem %s18_s13, 32 }
   0x5   :  { %p296_p0 = scmp.ne.s32.totalorder %s18_s13, %s295_s16  ;;  %p300_p1 = scmp.lt.s32.totalorder %s18_s13, %s18_s13 }
   0x6   :  { %p301_p2 = scmp.lt.s32.totalorder %s299_s17, %s295_s16 }
   0x8   :  { %p302_p3 = por %p301_p2, %p300_p1 }
   0xa   :  { %p303_p4 = pnand %p302_p3, %p296_p0 }
   0xc   :  { %306 = shalt.err (!%p303_p4)
}
   0xd   :  { %20 = dma.hbm_to_vmem [thread:$0]  %s403_s0, 16, %s18_s13, [#allocation3]  }
   0xe   :  { %s315_s20 = scalar_lea.vmem %s27_s15, 384  ;;  %p320_p6 = scmp.lt.s32.totalorder %s27_s15, %s27_s15 }
   0xf   :  { %p316_p5 = scmp.ne.s32.totalorder %s27_s15, %s315_s20  ;;  %p321_p7 = scmp.lt.s32.totalorder %s315_s20, %s315_s20 }
  0x11   :  { %p322_p8 = por %p321_p7, %p320_p6 }
  0x13   :  { %p323_p9 = pnand %p322_p8, %p316_p5 }
  0x15   :  { %326 = shalt.err (!%p323_p9)
}
  0x16   :  { %s355_s21 = smov 64   ;;  %s356_s22 = smov 4  }
  0x17   :  { %32 = dma.hbm_to_vmem [thread:$0]  %s404_s1, 384, %s27_s15, [#allocation6], %s355_s21, %s355_s21, %s356_s22  }
  0x18   :  { %347 = dma.done.wait [#allocation3], 16  }
  0x19   :  { %348 = vsyncadd [#allocation3], 4294967280 }
  0x1a   :  { %349 = dma.done.wait [#allocation6], 384  }
  0x1b   :  { %350 = vsyncadd [#allocation6], 4294966912  ;;  %v357_v0 = vmov 0.0   ;;  %vm358_vm0 = vmmov 0   ;;  %v284_v1 = vld [vmem:[#allocation5] sm:$0xff]   ;;  %vm58_vm1 = vcmask 130048  }
  0x1c   :  { %257 = vmatprep.subr.bf16.mxu0 %v357_v0  ;;  %259 = vmatprep.mubr.msk.bf16.mxu0 %vm358_vm0, %v357_v0  ;;  %v42_v2 = vld [vmem:[#allocation2] sm:$0x1]  ;;  %v285_v3 = vld [vmem:[#allocation5 + $0x8] sm:$0xff]   ;;  %v286_v4 = vld [vmem:[#allocation5 + $0x10] sm:$0xff]   ;;  %vm102_vm2 = vcmask 254976   ;;  %s359_s27 = smov [#allocation7]  }
  0x1d   :  { %263 = vmatprep.subr.bf16.mxu1 %v357_v0  ;;  %265 = vmatprep.mubr.msk.bf16.mxu1 %vm358_vm0, %v357_v0  ;;  %v240_v5 = vld [vmem:[%s405_s2] ss:$0 sm:$0xff]  ;;  %v244_v7 = vld [vmem:[%s405_s2 + $0x1] ss:$0 sm:$0xff]  ;;  %s227_s28 = sshll.u32 %s359_s27, 4  ;;  %s228_s28 = int_to_ptr.vmem [resolvable:$true] %s227_s28 }
  0x1e   :  { %258 = vmatpush3.bf16.msra.mxu0 %v284_v1  ;;  %264 = vmatpush3.bf16.msra.mxu1 %v285_v3  ;;  %v248_v16 = vld [vmem:[%s405_s2 + $0x2] ss:$0 sm:$0xff]  ;;  %s327_s4 = scalar_lea.vmem %s228_s28, 96  ;;  %p332_p11 = scmp.lt.s32.totalorder %s228_s28, %s228_s28 }
  0x1f   :  { %269 = vmatprep.subr.bf16.mxu0 %v357_v0  ;;  %p328_p10 = scmp.ne.s32.totalorder %s228_s28, %s327_s4  ;;  %p333_p12 = scmp.lt.s32.totalorder %s327_s4, %s327_s4 }
  0x21   :  { %260 = vmatmul.mubr.msk.bf16.vlgmr.msra.gmra.mxu0 %vm58_vm1, %v42_v2  ;;  %266 = vmatmul.mubr.msk.bf16.vlgmr.msra.gmra.mxu1 %vm58_vm1, %v42_v2  ;;  %p334_p13 = por %p333_p12, %p332_p11 }
  0x22   :  { %270 = vmatpush3.bf16.msra.mxu0 %v286_v4  ;;  %271 = vmatprep.mubr.msk.bf16.mxu0 %vm358_vm0, %v357_v0 }
  0x23   :  { %p335_p0 = pnand %p334_p13, %p328_p10 }
  0x29   :  { %272 = vmatmul.mubr.msk.bf16.vlgmr.msra.gmra.mxu0 %vm58_vm1, %v42_v2 }
  0xe1   :  { %v96_v6 = vpop.f32.mrf.mxu0  ;;  %v155_v10 = vpop.f32.mrf.mxu1 }
  0xe2   :  { %v97_v8 = vadd.f32 %v240_v5, %v96_v6  ;;  %v156_v11 = vadd.f32 %v244_v7, %v155_v10 }
  0xe3   :  { %v261_v9 = vpop.f32.mrf.mxu0  ;;  %v267_v13 = vpop.f32.mrf.mxu1 }
  0xe4   :  { %103 = vst.msk [vmem:[#allocation7] sm:$0x3] %vm102_vm2, %v97_v8  ;;  %162 = vst.msk [vmem:[#allocation7 + $0x2] sm:$0x3] %vm102_vm2, %v156_v11 }
  0xe5   :  { %v99_v12 = vpop.f32.mrf.mxu0  ;;  %v158_v15 = vpop.f32.mrf.mxu1 }
  0xe7   :  { %v262_v14 = vpop.f32.mrf.mxu0  ;;  %v268_v18 = vpop.f32.mrf.mxu1 }
  0xe9   :  { %v214_v17 = vpop.f32.mrf.mxu0 }
  0xea   :  { %v215_v19 = vadd.f32 %v248_v16, %v214_v17 }
  0xeb   :  { %v273_v20 = vpop.f32.mrf.mxu0 }
  0xec   :  { %221 = vst.msk [vmem:[#allocation7 + $0x4] sm:$0x3] %vm102_vm2, %v215_v19 }
  0xed   :  { %v217_v21 = vpop.f32.mrf.mxu0 }
  0xee   :  { %338 = shalt.err (!%p335_p0)
}
  0xef   :  { %s360_s5 = smov 32   ;;  %s361_s6 = smov 2   ;;  %v274_v22 = vpop.f32.mrf.mxu0 }
  0xf0   :  { %233 = dma.vmem_to_hbm [thread:$0]  %s228_s28, 96, %s406_s3, [#allocation4], %s360_s5, %s360_s5, %s361_s6  }
  0xf1   :  { %351 = dma.done.wait [#allocation4], 96  }
  0xf2   :  { %352 = vsyncadd [#allocation4], 4294967200 }
  0xf3   :  { %237 = vsyncpa [#allocation3], 1 }
  0xf4   :  { %238 = vsyncpa [#allocation6], 1 }
  0xf5   :  { %239 = vsyncpa [#allocation4], 1 }

</bundles_post_ra>
